<compile_context>
chip_gen: v7x
topology: tpu7x:2x2x1
jax: 0.10.0
libtpu: 0.0.40
codegen_flags: <defaults>
</compile_context>

<pallas_src>
import math
from functools import partial

import numpy as np
import jax
import jax.numpy as jnp
from jax.experimental import pallas as pl
from jax.experimental.pallas import tpu as pltpu

HIDDEN = 128        # stands in for 768
NHEAD = 8
HEAD_DIM = HIDDEN // NHEAD
FFN = 256           # stands in for 3072 (BERT) / 2048 (nn.TransformerEncoderLayer)
GROVER_DIM = 256    # stands in for 1200
NUM_CA_LAYERS = 2
NEG_INF = -1e9      # additive mask value (stands in for torch -inf masking)
VMEM_LIMIT = 32 * 1024 * 1024   # above v5e's 16 MiB default scoped limit, safe on v6e/v7x
BLOCK_ROWS = 256    # row-tile size for the row-parallel matmul kernels


def _round_up(n, m):
    return ((n + m - 1) // m) * m


def _pad_to_rows(x, rows):
    pad = rows - x.shape[0]
    if pad <= 0:
        return x
    return jnp.concatenate([x, jnp.zeros((pad,) + x.shape[1:], x.dtype)], axis=0)


def _zero_map(nd):
    return lambda i: (0,) * nd


# ---------------------------------------------------------------------------
# In-kernel helpers (pure jnp, f32 math)
# ---------------------------------------------------------------------------

def _gelu(x):
    # TODO(synk): HF BertLayer defaults to exact erf gelu; tanh approximation used here.
    return 0.5 * x * (1.0 + jnp.tanh(0.7978845608028654 * (x + 0.044715 * x * x * x)))


def _layernorm(h, g, b, eps):
    mu = jnp.mean(h, axis=-1, keepdims=True)
    var = jnp.mean((h - mu) * (h - mu), axis=-1, keepdims=True)
    return (h - mu) * jax.lax.rsqrt(var + eps) * g + b


# ---------------------------------------------------------------------------
# Pallas kernels
# ---------------------------------------------------------------------------

def _linear_kernel(x_ref, w_ref, b_ref, o_ref):
    """y = x @ W + b; bf16 MXU inputs, f32 accumulation, bf16 output tile."""
    y = jnp.dot(x_ref[...].astype(jnp.bfloat16), w_ref[...],
                preferred_element_type=jnp.float32) + b_ref[...]
    o_ref[...] = y.astype(o_ref.dtype)


def _ffn_ln_kernel(x_ref, w1_ref, b1_ref, w2_ref, b2_ref, g_ref, be_ref, o_ref, *, eps):
    """Row-tiled residual FFN + post-LayerNorm (GROVER sub-layer stand-in)."""
    x = x_ref[...].astype(jnp.float32)
    h = jnp.dot(x_ref[...].astype(jnp.bfloat16), w1_ref[...],
                preferred_element_type=jnp.float32) + b1_ref[...]
    h = _gelu(h)
    h = jnp.dot(h.astype(jnp.bfloat16), w2_ref[...],
                preferred_element_type=jnp.float32) + b2_ref[...]
    o_ref[...] = _layernorm(x + h, g_ref[...], be_ref[...], eps).astype(o_ref.dtype)


def _attn_kernel(q_ref, k_ref, v_ref, m_ref, o_ref, *, scale):
    """One (batch, head) attention slice: dense 2-D (S, dh) tiles, f32 softmax."""
    q = q_ref[0].astype(jnp.bfloat16)                 # (S, dh)
    k = k_ref[0].astype(jnp.bfloat16)
    v = v_ref[0].astype(jnp.bfloat16)
    s = jnp.dot(q, k.T, preferred_element_type=jnp.float32) * scale   # (S, S)
    s = s + m_ref[0]                                  # (1, S) additive key mask
    s = s - jnp.max(s, axis=-1, keepdims=True)
    p = jnp.exp(s)
    p = p * pl.reciprocal(jnp.sum(p, axis=-1, keepdims=True), approx=True)
    ctx = jnp.dot(p.astype(jnp.bfloat16), v, preferred_element_type=jnp.float32)
    o_ref[0] = ctx.astype(o_ref.dtype)


def _post_attn_kernel(x_ref, a_ref, wo_ref, bo_ref, g1_ref, b1_ref,
                      w1_ref, f1_ref, w2_ref, f2_ref, g2_ref, b2_ref,
                      o_ref, *, act, eps):
    """Row-tiled: out-proj -> residual+LN -> FFN -> residual+LN (post-LN block)."""
    x = x_ref[...].astype(jnp.float32)
    attn = jnp.dot(a_ref[...].astype(jnp.bfloat16), wo_ref[...],
                   preferred_element_type=jnp.float32) + bo_ref[...]
    h1 = _layernorm(x + attn, g1_ref[...], b1_ref[...], eps)
    ff = jnp.dot(h1.astype(jnp.bfloat16), w1_ref[...],
                 preferred_element_type=jnp.float32) + f1_ref[...]
    ff = _gelu(ff) if act == "gelu" else jnp.maximum(ff, 0.0)
    ff = jnp.dot(ff.astype(jnp.bfloat16), w2_ref[...],
                 preferred_element_type=jnp.float32) + f2_ref[...]
    o_ref[...] = _layernorm(h1 + ff, g2_ref[...], b2_ref[...], eps).astype(o_ref.dtype)


def _text_mean_kernel(x_ref, m_ref, o_ref, *, inv_t):
    """Masked mean over the sequence axis (divides by full T, like torch.mean)."""
    s = jnp.sum(x_ref[...].astype(jnp.float32) * m_ref[...], axis=1)   # (B, H)
    o_ref[...] = (s * inv_t).astype(o_ref.dtype)


def _mol_mean_kernel(st_ref, sz_ref, f_ref, o_ref):
    """Per-molecule mean of atom rows via a (B, n_atoms) segment-matrix matmul."""
    nb = o_ref.shape[0]
    na = f_ref.shape[0]
    col = jax.lax.broadcasted_iota(jnp.int32, (nb, na), 1)
    st = st_ref[...]                                   # (B, 1) int32
    sz = sz_ref[...]
    seg = (col >= st) & (col < st + sz)
    w = jnp.where(seg, 1.0, 0.0).astype(jnp.bfloat16)  # (B, na)
    sums = jnp.dot(w, f_ref[...].astype(jnp.bfloat16),
                   preferred_element_type=jnp.float32)
    counts = jnp.maximum(sz.astype(jnp.float32), 1.0)  # guard size-0 segments
    o_ref[...] = (sums * pl.reciprocal(counts, approx=True)).astype(o_ref.dtype)


# ---------------------------------------------------------------------------
# Pallas wrappers
# ---------------------------------------------------------------------------

def _row_call(kernel, row_args, full_args, out_dim, out_dtype, block_rows=BLOCK_ROWS):
    """Row-tiled pallas_call: row_args are tiled over the first axis, full_args
    (weights / biases / LN params) stay VMEM-resident with constant index maps."""
    m = row_args[0].shape[0]
    if m <= block_rows:
        bm = _round_up(m, 8)
        mp = bm
    else:
        bm = block_rows
        mp = _round_up(m, bm)
    row_args = [_pad_to_rows(a, mp) for a in row_args]
    in_specs = [pl.BlockSpec((bm, a.shape[1]), lambda i: (i, 0)) for a in row_args]
    in_specs += [pl.BlockSpec(a.shape, _zero_map(a.ndim)) for a in full_args]
    out = pl.pallas_call(
        kernel,
        out_shape=jax.ShapeDtypeStruct((mp, out_dim), out_dtype),
        grid=(mp // bm,),
        in_specs=in_specs,
        out_specs=pl.BlockSpec((bm, out_dim), lambda i: (i, 0)),
        compiler_params=pltpu.CompilerParams(
            dimension_semantics=("parallel",), vmem_limit_bytes=VMEM_LIMIT),
    )(*row_args, *full_args)
    return out[:m] if mp != m else out


def _single_call(kernel, out_shape, *arrays):
    in_specs = [pl.BlockSpec(a.shape, _zero_map(a.ndim)) for a in arrays]
    return pl.pallas_call(
        kernel,
        out_shape=out_shape,
        grid=(1,),
        in_specs=in_specs,
        out_specs=pl.BlockSpec(out_shape.shape, _zero_map(len(out_shape.shape))),
        compiler_params=pltpu.CompilerParams(
            dimension_semantics=("arbitrary",), vmem_limit_bytes=VMEM_LIMIT),
    )(*arrays)


def _attention(q, k, v, add_mask):
    """q/k/v: (B*nh, S, dh) bf16; add_mask: (B, 1, S) f32 additive key mask."""
    bh, s, dh = q.shape
    return pl.pallas_call(
        partial(_attn_kernel, scale=1.0 / math.sqrt(dh)),
        out_shape=jax.ShapeDtypeStruct((bh, s, dh), jnp.bfloat16),
        grid=(bh,),
        in_specs=[pl.BlockSpec((1, s, dh), lambda i: (i, 0, 0)),
                  pl.BlockSpec((1, s, dh), lambda i: (i, 0, 0)),
                  pl.BlockSpec((1, s, dh), lambda i: (i, 0, 0)),
                  pl.BlockSpec((1, 1, s), lambda i: (i // NHEAD, 0, 0))],
        out_specs=pl.BlockSpec((1, s, dh), lambda i: (i, 0, 0)),
        compiler_params=pltpu.CompilerParams(
            dimension_semantics=("parallel",), vmem_limit_bytes=VMEM_LIMIT),
    )(q, k, v, add_mask)


def row_linear(x, w, b, out_dtype=jnp.bfloat16):
    return _row_call(_linear_kernel, [x], [w, b], w.shape[1], out_dtype)


def grover_sub_layer(f_atoms, p):
    # TODO(synk): the full GROVER GTransEncoder message passing (a2b/b2a/a2a gathers,
    # multi-head graph attention) has no clean Pallas mapping here; a per-atom
    # residual FFN + LayerNorm stands in for the node-embedding update.
    return _row_call(
        partial(_ffn_ln_kernel, eps=1e-5), [f_atoms],
        [p["w1"], p["b1"], p["w2"], p["b2"], p["ln_g"], p["ln_b"]],
        f_atoms.shape[1], jnp.bfloat16)


def transformer_block(x, add_mask, p, act, eps):
    """x: (B, S, H) bf16; add_mask: (B, 1, S) additive. One post-LN encoder block.
    Matches transformers.BertLayer (act='gelu') / nn.TransformerEncoderLayer
    defaults (act='relu'). Dropout is identity (inference)."""
    b, s, h = x.shape
    m = b * s
    x2 = x.reshape(m, h)

    # 1) row-tiled fused QKV projection
    qkv = row_linear(x2, p["wqkv"], p["bqkv"])                       # (M, 3H) bf16
    # head split done once by XLA between kernels (no 16-lane in-kernel slices)
    qkv = jnp.transpose(qkv.reshape(b, s, 3, NHEAD, HEAD_DIM), (2, 0, 3, 1, 4))
    q = qkv[0].reshape(b * NHEAD, s, HEAD_DIM)
    k = qkv[1].reshape(b * NHEAD, s, HEAD_DIM)
    v = qkv[2].reshape(b * NHEAD, s, HEAD_DIM)

    # 2) per-(batch, head) attention kernel, grid marked parallel (megacore)
    ctx = _attention(q, k, v, add_mask)                              # (B*nh, S, dh)
    attn2 = jnp.transpose(ctx.reshape(b, NHEAD, s, HEAD_DIM),
                          (0, 2, 1, 3)).reshape(m, h)

    # 3) row-tiled fused out-proj + add&LN + FFN + add&LN
    out2 = _row_call(
        partial(_post_attn_kernel, act=act, eps=eps), [x2, attn2],
        [p["wo"], p["bo"], p["ln1_g"], p["ln1_b"],
         p["w1"], p["b1"], p["w2"], p["b2"], p["ln2_g"], p["ln2_b"]],
        h, jnp.bfloat16)
    return out2.reshape(b, s, h)


def text_mean(x, attention_mask):
    b, t, h = x.shape
    m = attention_mask.astype(jnp.float32)[:, :, None]               # (B, T, 1)
    return _single_call(partial(_text_mean_kernel, inv_t=1.0 / t),
                        jax.ShapeDtypeStruct((b, h), jnp.float32), x, m)


def mol_mean(f_atoms, a_start, a_size):
    na, h = f_atoms.shape
    b = a_start.shape[0]
    return _single_call(_mol_mean_kernel,
                        jax.ShapeDtypeStruct((b, h), jnp.float32),
                        a_start, a_size, f_atoms)


# ---------------------------------------------------------------------------
# CrossEncoderLayer bookkeeping (computed ONCE per forward, pure numpy)
# ---------------------------------------------------------------------------

def _make_cross_plan(input_type, a_scope, text_sizes, t_text, na_pad, bsz):
    atom_starts = [int(st) for (st, _) in a_scope]
    atom_sizes = [int(sz) for (_, sz) in a_scope]
    use_mol = input_type in ("both", "mol")
    use_text = input_type in ("both", "text")
    if input_type == "both":
        total_lens = [atom_sizes[i] + text_sizes[i] for i in range(bsz)]
        max_feat = max(atom_sizes[i] + t_text for i in range(bsz)) + 1
    elif input_type == "mol":
        total_lens = list(atom_sizes)
        max_feat = max(atom_sizes) + 1
    else:  # "text"
        total_lens = list(text_sizes)
        max_feat = max(text_sizes) + 1
    s_pad = _round_up(max_feat, 128)          # lane-dense keys/scores in the trans block

    zero_row_idx = na_pad + bsz * t_text
    gidx = np.full((bsz, s_pad), zero_row_idx, np.int32)
    # Reproduces the reference src_key_padding_mask convention: VALID positions
    # are masked (-1e9), reference padding positions [total_len, max_feat) attend
    # (0.0), positions >= max_feat only exist because of round-to-128 and are
    # always excluded.
    mask_np = np.full((bsz, s_pad), NEG_INF, np.float32)
    for b in range(bsz):
        n_at = atom_sizes[b] if use_mol else 0
        if use_mol:
            gidx[b, :n_at] = atom_starts[b] + np.arange(n_at)
        if use_text:
            gidx[b, n_at:n_at + t_text] = na_pad + b * t_text + np.arange(t_text)
        mask_np[b, total_lens[b]:max_feat] = 0.0

    fa_idx = None
    lh_idx = None
    if use_mol:
        fa_idx = np.arange(bsz * s_pad, bsz * s_pad + na_pad, dtype=np.int32)
        for b in range(bsz):
            st, sz = atom_starts[b], atom_sizes[b]
            fa_idx[st:st + sz] = b * s_pad + np.arange(sz)
    if use_text:
        lh_idx = np.arange(bsz * s_pad, bsz * s_pad + bsz * t_text, dtype=np.int32)
        for b in range(bsz):
            n_at = atom_sizes[b] if input_type == "both" else 0
            ts = text_sizes[b]
            lh_idx[b * t_text: b * t_text + ts] = b * s_pad + n_at + np.arange(ts)

    return dict(use_mol=use_mol, use_text=use_text, s_pad=s_pad,
                gidx=jnp.asarray(gidx.reshape(-1)),
                add_mask=jnp.asarray(mask_np)[:, None, :],
                fa_idx=None if fa_idx is None else jnp.asarray(fa_idx),
                lh_idx=None if lh_idx is None else jnp.asarray(lh_idx))


def cross_encoder_layer(p, text_state, grover_state, plan):
    last_hidden_state, extended_attention_mask, attention_mask = text_state
    f_atoms, f_bonds, a_scope = grover_state
    bsz, t_text, hid = last_hidden_state.shape

    if plan["use_text"]:
        last_hidden_state = transformer_block(
            last_hidden_state, extended_attention_mask, p["bert"], act="gelu", eps=1e-12)
    if plan["use_mol"]:
        f_atoms = grover_sub_layer(f_atoms, p["grover"])

    # ---- combine + pad with one static gather (indices precomputed once) ----
    lhs_flat = last_hidden_state.reshape(bsz * t_text, hid)
    src = jnp.concatenate(
        [f_atoms, lhs_flat, jnp.zeros((1, hid), f_atoms.dtype)], axis=0)
    s_pad = plan["s_pad"]
    x = jnp.take(src, plan["gidx"], axis=0).reshape(bsz, s_pad, hid)

    trans_out = transformer_block(x, plan["add_mask"], p["trans"], act="relu", eps=1e-5)
    trans_flat = trans_out.reshape(bsz * s_pad, hid)

    # ---- write back with single static gathers (indices precomputed once) ----
    if plan["use_mol"]:
        f_atoms = jnp.take(jnp.concatenate([trans_flat, f_atoms], axis=0),
                           plan["fa_idx"], axis=0)
    if plan["use_text"]:
        last_hidden_state = jnp.take(
            jnp.concatenate([trans_flat, lhs_flat], axis=0),
            plan["lh_idx"], axis=0).reshape(bsz, t_text, hid)

    return ((last_hidden_state, extended_attention_mask, attention_mask),
            (f_atoms, f_bonds, a_scope))


def crossmol_forward(params, grover_backbone_out, text_backbone_out):
    # TODO(synk): pretrained GROVER backbone + BioBERT backbone (external checkpoints,
    # tokenizer) are not reimplemented; their outputs are supplied as synthetic inputs.
    atom_from_atom, bond_from_atom, a_scope = grover_backbone_out
    last_hidden_state, attention_mask_np = text_backbone_out

    attention_mask_np = np.asarray(attention_mask_np)
    attention_mask = jnp.asarray(attention_mask_np, jnp.int32)
    bsz, t_text, _ = last_hidden_state.shape
    text_sizes = [int(s) for s in attention_mask_np.sum(axis=1)]   # host-only, once

    # pad row counts to multiples of 8 once (padded rows are never read back);
    # activations stored bf16 in HBM, f32 math inside the kernels.
    atom_from_atom = _pad_to_rows(atom_from_atom.astype(jnp.bfloat16),
                                  _round_up(atom_from_atom.shape[0], 8))
    bond_from_atom = _pad_to_rows(bond_from_atom.astype(jnp.bfloat16),
                                  _round_up(bond_from_atom.shape[0], 8))
    na_pad = atom_from_atom.shape[0]

    # single fused 1200->768 projection for atoms + bonds (row-tiled)
    ab = row_linear(jnp.concatenate([atom_from_atom, bond_from_atom], axis=0),
                    params["gl_w"], params["gl_b"])
    f_atoms = ab[:na_pad]
    f_bonds = ab[na_pad:]

    last_hidden_state = last_hidden_state.astype(jnp.bfloat16)
    ext_mask = ((1.0 - attention_mask.astype(jnp.float32)) * NEG_INF)[:, None, :]

    # per-input_type bookkeeping computed once and reused by every layer
    plans = {t: _make_cross_plan(t, a_scope, text_sizes, t_text, na_pad, bsz)
             for t in ("both", "text", "mol")}

    tb = (last_hidden_state, ext_mask, attention_mask)
    gb = (f_atoms, f_bonds, a_scope)
    tb1, gb1 = tb, gb
    tb2, gb2 = tb, gb

    for lp in params["layers"]:
        tb, gb = cross_encoder_layer(lp, tb, gb, plans["both"])
    for lp in params["layers"]:
        tb1, gb1 = cross_encoder_layer(lp, tb1, gb1, plans["text"])
    for lp in params["layers"]:
        tb2, gb2 = cross_encoder_layer(lp, tb2, gb2, plans["mol"])

    a_start = jnp.array([[st] for (st, _) in a_scope], jnp.int32)   # (B, 1)
    a_size = jnp.array([[sz] for (_, sz) in a_scope], jnp.int32)    # (B, 1)

    e1_mol = mol_mean(gb[0], a_start, a_size)
    e1_text = text_mean(tb[0], attention_mask)
    e2_text = text_mean(tb1[0], attention_mask)
    e3_mol = mol_mean(gb2[0], a_start, a_size)
    return e1_mol, e1_text, e2_text, e3_mol


# ---------------------------------------------------------------------------
# Deterministic parameter init (weights bf16 for the MXU, biases/LN f32)
# ---------------------------------------------------------------------------

def _w(key, shape):
    return (jax.random.normal(key, shape, jnp.float32) * 0.02).astype(jnp.bfloat16)


def init_block(key, h, ffn):
    ks = jax.random.split(key, 4)
    return dict(
        wqkv=_w(ks[0], (h, 3 * h)), bqkv=jnp.zeros((1, 3 * h), jnp.float32),
        wo=_w(ks[1], (h, h)), bo=jnp.zeros((1, h), jnp.float32),
        ln1_g=jnp.ones((1, h), jnp.float32), ln1_b=jnp.zeros((1, h), jnp.float32),
        w1=_w(ks[2], (h, ffn)), b1=jnp.zeros((1, ffn), jnp.float32),
        w2=_w(ks[3], (ffn, h)), b2=jnp.zeros((1, h), jnp.float32),
        ln2_g=jnp.ones((1, h), jnp.float32), ln2_b=jnp.zeros((1, h), jnp.float32),
    )


def init_grover_sub(key, h, ffn):
    k1, k2 = jax.random.split(key)
    return dict(
        w1=_w(k1, (h, ffn)), b1=jnp.zeros((1, ffn), jnp.float32),
        w2=_w(k2, (ffn, h)), b2=jnp.zeros((1, h), jnp.float32),
        ln_g=jnp.ones((1, h), jnp.float32), ln_b=jnp.zeros((1, h), jnp.float32),
    )


def init_params(key):
    kgl, klayers = jax.random.split(key)
    layers = []
    lkeys = jax.random.split(klayers, NUM_CA_LAYERS)
    for i in range(NUM_CA_LAYERS):
        kb, kg, kt = jax.random.split(lkeys[i], 3)
        layers.append(dict(bert=init_block(kb, HIDDEN, FFN),
                           grover=init_grover_sub(kg, HIDDEN, FFN),
                           trans=init_block(kt, HIDDEN, FFN)))
    return dict(gl_w=_w(kgl, (GROVER_DIM, HIDDEN)),
                gl_b=jnp.zeros((1, HIDDEN), jnp.float32),
                layers=layers)


# ---------------------------------------------------------------------------
# Main
# ---------------------------------------------------------------------------

if __name__ == "__main__":
    key = jax.random.PRNGKey(0)
    k1, k2, k3, kp = jax.random.split(key, 4)

    B, T = 2, 8
    atom_sizes = [5, 7]
    a_scope = [(1, 5), (6, 7)]                  # (start index into f_atoms, num atoms)
    n_atoms = 1 + sum(atom_sizes)               # row 0 is the GROVER dummy atom
    n_bonds = 1 + 20

    # synthetic GROVER backbone outputs ('atom_from_atom', 'bond_from_atom')
    atom_from_atom = jax.random.normal(k1, (n_atoms, GROVER_DIM), jnp.float32)
    bond_from_atom = jax.random.normal(k2, (n_bonds, GROVER_DIM), jnp.float32)
    # synthetic BERT backbone last_hidden_state + attention_mask (padding='longest')
    last_hidden_state = jax.random.normal(k3, (B, T, HIDDEN), jnp.float32)
    attention_mask = np.array([[1] * 8, [1] * 4 + [0] * 4], np.int32)

    params = init_params(kp)

    e1_mol, e1_text, e2_text, e3_mol = crossmol_forward(
        params,
        (atom_from_atom, bond_from_atom, a_scope),
        (last_hidden_state, attention_mask),
    )
    for out in (e1_mol, e1_text, e2_text, e3_mol):
        jax.block_until_ready(out)

    assert e1_mol.shape == (B, HIDDEN)
    assert e1_text.shape == (B, HIDDEN)
    assert e2_text.shape == (B, HIDDEN)
    assert e3_mol.shape == (B, HIDDEN)
    assert all(bool(jnp.all(jnp.isfinite(o))) for o in (e1_mol, e1_text, e2_text, e3_mol))

    print("KERNEL_OK")
</pallas_src>

<mosaic_0001>
module attributes {stable_mosaic.version = 11 : i64} {
  func.func @_linear_kernel(%arg0: i32, %arg1: memref<40x256xbf16, #tpu.memory_space<vmem>>, %arg2: memref<256x128xbf16, #tpu.memory_space<vmem>>, %arg3: memref<1x128xf32, #tpu.memory_space<vmem>>, %arg4: memref<40x128xbf16, #tpu.memory_space<vmem>>) attributes {dimension_semantics = [#tpu.dimension_semantics<parallel>], iteration_bounds = array<i64: 1>, scalar_prefetch = 0 : i64, scratch_operands = 0 : i64, tpu.core_type = #tpu.core_type<tc>, window_params = [{transform_indices = @transform_0, window_bounds = array<i64: 40, 256>}, {pipeline_mode = #tpu.pipeline_mode<synchronous>, transform_indices = @transform_1, window_bounds = array<i64: 256, 128>}, {pipeline_mode = #tpu.pipeline_mode<synchronous>, transform_indices = @transform_2, window_bounds = array<i64: 1, 128>}, {transform_indices = @transform_3, window_bounds = array<i64: 40, 128>}]} {
    %c0 = arith.constant 0 : index
    %c0_0 = arith.constant 0 : index
    %0 = vector.load %arg1[%c0, %c0_0] : memref<40x256xbf16, #tpu.memory_space<vmem>>, vector<40x256xbf16>
    %c0_1 = arith.constant 0 : index
    %c0_2 = arith.constant 0 : index
    %1 = vector.load %arg2[%c0_1, %c0_2] : memref<256x128xbf16, #tpu.memory_space<vmem>>, vector<256x128xbf16>
    %cst = arith.constant dense<0.000000e+00> : vector<40x128xf32>
    %2 = tpu.matmul %0, %1, %cst {dimension_numbers = #tpu.dot_dimension_numbers<[1], [0], [0], [1], [0, 0, 1, 1], [], []>} : vector<40x256xbf16>, vector<256x128xbf16>, vector<40x128xf32> -> vector<40x128xf32>
    %c0_3 = arith.constant 0 : index
    %c0_4 = arith.constant 0 : index
    %3 = vector.load %arg3[%c0_3, %c0_4] : memref<1x128xf32, #tpu.memory_space<vmem>>, vector<1x128xf32>
    %4 = vector.broadcast %3 : vector<1x128xf32> to vector<40x128xf32>
    %5 = arith.addf %2, %4 : vector<40x128xf32>
    %6 = arith.truncf %5 : vector<40x128xf32> to vector<40x128xbf16>
    %c0_5 = arith.constant 0 : index
    %c0_6 = arith.constant 0 : index
    %7 = vector.load %arg4[%c0_5, %c0_6] : memref<40x128xbf16, #tpu.memory_space<vmem>>, vector<40x128xbf16>
    tpu.vector_store %arg4[%c0_5, %c0_6], %6 {strides = array<i32>} : memref<40x128xbf16, #tpu.memory_space<vmem>>, vector<40x128xbf16>,
    return
  }
  func.func @transform_0(%arg0: i32) -> (i32, i32) {
    %c0_i32 = arith.constant 0 : i32
    %c0_i32_0 = arith.constant 0 : i32
    return %arg0, %c0_i32 : i32, i32
  }
  func.func @transform_1(%arg0: i32) -> (i32, i32) {
    %c0_i32 = arith.constant 0 : i32
    %c0_i32_0 = arith.constant 0 : i32
    %c0_i32_1 = arith.constant 0 : i32
    return %c0_i32, %c0_i32_0 : i32, i32
  }
  func.func @transform_2(%arg0: i32) -> (i32, i32) {
    %c0_i32 = arith.constant 0 : i32
    %c0_i32_0 = arith.constant 0 : i32
    %c0_i32_1 = arith.constant 0 : i32
    return %c0_i32, %c0_i32_0 : i32, i32
  }
  func.func @transform_3(%arg0: i32) -> (i32, i32) {
    %c0_i32 = arith.constant 0 : i32
    %c0_i32_0 = arith.constant 0 : i32
    return %arg0, %c0_i32 : i32, i32
  }
}

</mosaic_0001>

<bundles_post_ra>
// kernel: tpu_custom_call.1
= control target key start
LH: loop header
LB: loop body
LE: loop exit
PB: predicated region body
PF: predicated region fallthrough
CT: control target
= control target key end

     0   :  { %8 = vsyncpa [#allocation3], 0  ;;  %s580_s0 = inlined_call_operand.hbm [shape: bf16[40,256], index: 0, kind: input, shape index: {}]   ;;  %s581_s1 = inlined_call_operand.hbm [shape: bf16[256,128], index: 1, kind: input, shape index: {}]   ;;  %s582_s2 = inlined_call_operand.vmem [shape: f32[1,128], index: 2, kind: input, shape index: {}]   ;;  %s583_s3 = inlined_call_operand.hbm [shape: bf16[40,128], index: 3, kind: output, shape index: {}]  }
   0x1   :  { %9 = vsyncpa [#allocation6], 0 }
   0x2   :  { %10 = vsyncpa [#allocation4], 0  ;;  %s508_s12 = smov [#allocation2]   ;;  %s436_s16 = scalar_lea.hbm %s580_s0, 640 }
   0x3   :  { %s16_s13 = sshll.u32 %s508_s12, 4  ;;  %p437_p0 = scmp.ne.s32.totalorder %s580_s0, %s436_s16  ;;  %s17_s13 = int_to_ptr.vmem [resolvable:$true] %s16_s13 }
   0x4   :  { %p440_p1 = scmp.lt.u32.totalorder %s436_s16, %s580_s0 }
   0x6   :  { %p442_p2 = pnand %p440_p1, %p437_p0 }
   0x8   :  { %445 = shalt.err (!%p442_p2)
}
   0x9   :  { %s446_s21 = scalar_lea.vmem %s17_s13, 640  ;;  %p451_p4 = scmp.lt.s32.totalorder %s17_s13, %s17_s13 }
   0xa   :  { %p447_p3 = scmp.ne.s32.totalorder %s17_s13, %s446_s21  ;;  %p452_p5 = scmp.lt.s32.totalorder %s446_s21, %s446_s21 }
   0xc   :  { %p453_p6 = por %p452_p5, %p451_p4 }
   0xe   :  { %p454_p7 = pnand %p453_p6, %p447_p3 }
  0x10   :  { %457 = shalt.err (!%p454_p7)
}
  0x11   :  { %s509_s22 = smov 128   ;;  %s510_s23 = smov 8  }
  0x12   :  { %22 = dma.hbm_to_vmem [thread:$0]  %s580_s0, 640, %s17_s13, [#allocation3], %s509_s22, %s509_s22, %s510_s23  }
  0x13   :  { %s511_s26 = smov [#allocation5]   ;;  %s458_s30 = scalar_lea.hbm %s581_s1, 2048 }
  0x14   :  { %s28_s27 = sshll.u32 %s511_s26, 4  ;;  %p459_p8 = scmp.ne.s32.totalorder %s581_s1, %s458_s30  ;;  %s29_s27 = int_to_ptr.vmem [resolvable:$true] %s28_s27 }
  0x15   :  { %p462_p9 = scmp.lt.u32.totalorder %s458_s30, %s581_s1 }
  0x17   :  { %p464_p10 = pnand %p462_p9, %p459_p8 }
  0x19   :  { %467 = shalt.err (!%p464_p10)
}
  0x1a   :  { %s468_s8 = scalar_lea.vmem %s29_s27, 2048  ;;  %p473_p12 = scmp.lt.s32.totalorder %s29_s27, %s29_s27 }
  0x1b   :  { %p469_p11 = scmp.ne.s32.totalorder %s29_s27, %s468_s8  ;;  %p474_p13 = scmp.lt.s32.totalorder %s468_s8, %s468_s8 }
  0x1d   :  { %p475_p0 = por %p474_p13, %p473_p12 }
  0x1f   :  { %p476_p1 = pnand %p475_p0, %p469_p11 }
  0x21   :  { %479 = shalt.err (!%p476_p1)
}
  0x22   :  { %s512_s0 = smov 64   ;;  %s513_s9 = smov 4  }
  0x23   :  { %34 = dma.hbm_to_vmem [thread:$0]  %s581_s1, 2048, %s29_s27, [#allocation6], %s512_s0, %s512_s0, %s513_s9  }
  0x24   :  { %502 = dma.done.wait [#allocation3], 640  }
  0x25   :  { %503 = vsyncadd [#allocation3], 4294966656 }
  0x26   :  { %504 = dma.done.wait [#allocation6], 2048  }
  0x27   :  { %505 = vsyncadd [#allocation6], 4294965248  ;;  %v412_v0 = vld [vmem:[#allocation5 + $0x40] sm:$0xff]   ;;  %v414_v2 = vld [vmem:[#allocation5 + $0x48] sm:$0xff]   ;;  %s514_s13 = smov [#allocation7]  }
  0x28   :  { %v413_v1 = vld [vmem:[#allocation5] sm:$0xff]   ;;  %389 = vmatprep.subr.bf16.mxu1 %v412_v0  ;;  %355 = vmatprep.subr.bf16.mxu0 %v412_v0  ;;  %v415_v3 = vld [vmem:[#allocation5 + $0x8] sm:$0xff]   ;;  %v416_v4 = vld [vmem:[#allocation5 + $0x50] sm:$0xff]   ;;  %s298_s14 = sshll.u32 %s514_s13, 4  ;;  %s299_s14 = int_to_ptr.vmem [resolvable:$true] %s298_s14 }
  0x29   :  { %397 = vmatpush3.bf16.msra.mxu1 %v413_v1  ;;  %356 = vmatpush3.bf16.msra.mxu0 %v413_v1  ;;  %v417_v5 = vld [vmem:[#allocation5 + $0x10] sm:$0xff]   ;;  %v418_v6 = vld [vmem:[#allocation5 + $0x58] sm:$0xff]   ;;  %v420_v8 = vld [vmem:[#allocation5 + $0x60] sm:$0xff]   ;;  %p485_p3 = scmp.lt.s32.totalorder %s299_s14, %s299_s14 }
  0x2a   :  { %390 = vmatprep.subr.bf16.mxu1 %v414_v2  ;;  %357 = vmatprep.subr.bf16.mxu0 %v414_v2  ;;  %v419_v7 = vld [vmem:[#allocation5 + $0x18] sm:$0xff]   ;;  %v421_v9 = vld [vmem:[#allocation5 + $0x20] sm:$0xff]   ;;  %v422_v10 = vld [vmem:[#allocation5 + $0x68] sm:$0xff]  }
  0x2b   :  { %v430_v11 = vld [vmem:[#allocation2 + $0x14] ss:$8 sps:$4 sm:$0xff]   ;;  %v433_v12 = vld [vmem:[#allocation2 + $0x4] ss:$8 sps:$4 sm:$0xff]   ;;  %v428_v19 = vld [vmem:[#allocation2 + $0x10] ss:$8 sps:$4 sm:$0xff]  }
  0x2c   :  { %v423_v13 = vld [vmem:[#allocation5 + $0x28] sm:$0xff]   ;;  %v424_v14 = vld [vmem:[#allocation5 + $0x70] sm:$0xff]   ;;  %251 = vmatprep.mubr.bf16.mxu1 %v430_v11  ;;  %243 = vmatprep.mubr.bf16.mxu0 %v433_v12  ;;  %v426_v16 = vld [vmem:[#allocation5 + $0x78] sm:$0xff]  }
  0x2d   :  { %398 = vmatpush3.bf16.msra.mxu1 %v415_v3  ;;  %358 = vmatpush3.bf16.msra.mxu0 %v415_v3  ;;  %v425_v15 = vld [vmem:[#allocation5 + $0x30] sm:$0xff]   ;;  %v427_v17 = vld [vmem:[#allocation5 + $0x38] sm:$0xff]  }
  0x2e   :  { %391 = vmatprep.subr.bf16.mxu1 %v416_v4  ;;  %359 = vmatprep.subr.bf16.mxu0 %v416_v4  ;;  %v48_v18 = vld [vmem:[#allocation2 + $0x20] sm:$0xff] }
  0x2f   :  { %v431_v20 = vld [vmem:[#allocation2] ss:$8 sps:$4 sm:$0xff]   ;;  %v317_v21 = vcombine.high %v48_v18, %v48_v18  ;;  %v316_v22 = vcombine.low %v48_v18, %v48_v18 }
  0x30   :  { %v311_v31 = vld [vmem:[%s582_s2] ss:$0 sm:$0xff]  ;;  %s480_s2 = scalar_lea.vmem %s299_s14, 320 }
  0x31   :  { %399 = vmatpush3.bf16.msra.mxu1 %v417_v5  ;;  %360 = vmatpush3.bf16.msra.mxu0 %v417_v5  ;;  %p481_p2 = scmp.ne.s32.totalorder %s299_s14, %s480_s2  ;;  %p486_p4 = scmp.lt.s32.totalorder %s480_s2, %s480_s2 }
  0x32   :  { %392 = vmatprep.subr.bf16.mxu1 %v418_v6  ;;  %361 = vmatprep.subr.bf16.mxu0 %v418_v6 }
  0x33   :  { %p487_p5 = por %p486_p4, %p485_p3 }
  0x35   :  { %400 = vmatpush3.bf16.msra.mxu1 %v419_v7  ;;  %362 = vmatpush3.bf16.msra.mxu0 %v419_v7  ;;  %p488_p6 = pnand %p487_p5, %p481_p2 }
  0x36   :  { %393 = vmatprep.subr.bf16.mxu1 %v420_v8  ;;  %363 = vmatprep.subr.bf16.mxu0 %v420_v8 }
  0x39   :  { %401 = vmatpush3.bf16.msra.mxu1 %v421_v9  ;;  %364 = vmatpush3.bf16.msra.mxu0 %v421_v9 }
  0x3a   :  { %394 = vmatprep.subr.bf16.mxu1 %v422_v10  ;;  %365 = vmatprep.subr.bf16.mxu0 %v422_v10 }
  0x3d   :  { %402 = vmatpush3.bf16.msra.mxu1 %v423_v13  ;;  %366 = vmatpush3.bf16.msra.mxu0 %v423_v13 }
  0x3e   :  { %395 = vmatprep.subr.bf16.mxu1 %v424_v14  ;;  %367 = vmatprep.subr.bf16.mxu0 %v424_v14 }
  0x41   :  { %403 = vmatpush3.bf16.msra.mxu1 %v425_v15  ;;  %368 = vmatpush3.bf16.msra.mxu0 %v425_v15 }
  0x42   :  { %396 = vmatprep.subr.bf16.mxu1 %v426_v16  ;;  %369 = vmatprep.subr.bf16.mxu0 %v426_v16 }
  0x45   :  { %404 = vmatpush3.bf16.msra.mxu1 %v427_v17  ;;  %370 = vmatpush3.bf16.msra.mxu0 %v427_v17 }
  0x48   :  { %252 = vmatmul.mubr.bf16.vlgmr.msra.gmra.mrb[0].mxu1 %v428_v19  ;;  %244 = vmatmul.mubr.bf16.vlgmr.msra.gmra.mrb[0].mxu0 %v431_v20 }
  0x49   :  { %259 = vmatprep.mubr.bf16.mxu1 %v317_v21 }
  0x50   :  { %260 = vmatmul.mubr.bf16.gmra.mrb[4].mxu1 %v316_v22 }
 0x11b   :  { %v377_v23 = vpop.f32.mrb[0].mxu1  ;;  %v371_v24 = vpop.f32.mrb[0].mxu0 }
 0x11c   :  { %v378_v25 = vpop.f32.mrb[1].mxu1  ;;  %v372_v26 = vpop.f32.mrb[1].mxu0 }
 0x11d   :  { %v379_v27 = vadd.f32 %v378_v25, %v377_v23  ;;  %v380_v28 = vpop.f32.mrb[2].mxu1  ;;  %v373_v29 = vadd.f32 %v372_v26, %v371_v24  ;;  %v374_v30 = vpop.f32.mrb[2].mxu0 }
 0x11e   :  { %v381_v32 = vpop.f32.mrb[3].mxu1  ;;  %v375_v33 = vpop.f32.mrb[3].mxu0 }
 0x11f   :  { %v382_v34 = vadd.f32 %v381_v32, %v380_v28  ;;  %v246_v35 = vadd.f32 %v373_v29, %v311_v31  ;;  %v376_v36 = vadd.f32 %v375_v33, %v374_v30  ;;  %v254_v37 = vadd.f32 %v379_v27, %v311_v31 }
 0x121   :  { %v257_v38 = vadd.f32 %v382_v34, %v311_v31  ;;  %v249_v39 = vadd.f32 %v376_v36, %v311_v31 }
 0x123   :  { %v352_v40 = vpack.c.bf16 %v257_v38, %v254_v37  ;;  %v347_v41 = vpack.c.bf16 %v249_v39, %v246_v35  ;;  %v383_v42 = vpop.f32.mrb[4].mxu1 }
 0x124   :  { %v384_v43 = vpop.f32.mrb[5].mxu1 }
 0x125   :  { %354 = vst [vmem:[#allocation7 + $0x8] sm:$0xff] %v352_v40   ;;  %348 = vst [vmem:[#allocation7] sm:$0xff] %v347_v41   ;;  %v385_v44 = vadd.f32 %v384_v43, %v383_v42  ;;  %v386_v45 = vpop.f32.mrb[6].mxu1 }
 0x126   :  { %v387_v46 = vpop.f32.mrb[7].mxu1 }
 0x127   :  { %v262_v47 = vadd.f32 %v385_v44, %v311_v31 }
 0x129   :  { %v343_v48 = vpack.c.bf16 %v262_v47, %v262_v47 }
 0x12b   :  { %292 = vst [vmem:[#allocation7 + $0x10] sm:$0xf] %v343_v48 }
 0x12c   :  { %491 = shalt.err (!%p488_p6)
}
 0x12d   :  { %s492_s17 = scalar_lea.hbm %s583_s3, 320 }
 0x12e   :  { %p493_p7 = scmp.ne.s32.totalorder %s583_s3, %s492_s17  ;;  %p496_p8 = scmp.lt.u32.totalorder %s492_s17, %s583_s3 }
 0x130   :  { %p498_p9 = pnand %p496_p8, %p493_p7 }
 0x132   :  { %501 = shalt.err (!%p498_p9)
}
 0x133   :  { %304 = dma.vmem_to_hbm [thread:$0]  %s299_s14, 320, %s583_s3, [#allocation4], %s512_s0, %s512_s0, %s513_s9  }
 0x134   :  { %506 = dma.done.wait [#allocation4], 320  }
 0x135   :  { %507 = vsyncadd [#allocation4], 4294966976 }
 0x136   :  { %308 = vsyncpa [#allocation3], 1 }
 0x137   :  { %309 = vsyncpa [#allocation6], 1 }
 0x138   :  { %310 = vsyncpa [#allocation4], 1 }

</bundles_post_ra>
